<compile_context>
chip_gen: v6e
topology: v6e:2x2x1
jax: 0.10.0
libtpu: 0.0.40
codegen_flags: <defaults>
</compile_context>

<pallas_src>
import functools

import jax
import jax.numpy as jnp
import numpy as np
from jax.experimental import pallas as pl
from jax.experimental.pallas import tpu as pltpu

NEG_INF = -1e30
LEAKY_SLOPE = 0.01  # F.leaky_relu default


def _attend_heads(z_all, sT_all, d_all, bias, num_heads, out_dim, mxu_dtype):
    """Per-head masked softmax over sources + aggregation (all vector math f32).

    z_all : [N, H*D]  source projections, all heads
    sT_all: [H, N]    source attention terms, pre-transposed (hoisted)
    d_all : [T, H]    destination attention terms for this dest tile
    bias  : [T, N]    additive mask in adj^T layout: 0 if edge i->j else NEG_INF
    returns [T, H*D]  merge='cat' output tile (single lane-dense store by caller)
    """
    outs = []
    for hd in range(num_heads):
        # e_t[j, i] = leaky_relu(s_i + d_j) + mask   (already destination-major)
        e_t = d_all[:, hd:hd + 1] + sT_all[hd:hd + 1, :]              # [T, N]
        e_t = jnp.maximum(e_t, LEAKY_SLOPE * e_t)                     # leaky_relu: mul+max
        e_t = e_t + bias                                              # additive edge mask
        # Softmax over incoming edges (sources) = lane axis.
        e_max = jnp.max(e_t, axis=-1, keepdims=True)                  # [T, 1]
        p = jnp.exp(e_t - e_max)                                      # masked -> 0
        denom = jnp.sum(p, axis=-1, keepdims=True)                    # [T, 1]
        alpha_t = p * pl.reciprocal(denom, approx=True)               # EUP vrcp
        z = z_all[:, hd * out_dim:(hd + 1) * out_dim]                 # [N, D]
        outs.append(jnp.dot(alpha_t.astype(mxu_dtype), z.astype(mxu_dtype),
                            preferred_element_type=jnp.float32))      # [T, D]
    return jnp.concatenate(outs, axis=-1)                             # [T, H*D]


def gat_fused_kernel(h_ref, wcat_ref, bias_ref, out_ref, *, num_heads, out_dim):
    # Gridless path (whole graph resident in VMEM).
    # h_ref   : [N, Fin]           MXU-input dtype (f32 or bf16)
    # wcat_ref: [Fin, H*D + 2H]    [ W^T | u_src^T | u_dst^T ]
    # bias_ref: [N, N] bf16        bias[j, i] = 0 if edge i->j else NEG_INF
    # out_ref : [N, H*D] f32       merge='cat'
    hd_total = num_heads * out_dim
    mxu_dtype = h_ref.dtype
    # Single fused MXU push for all heads' projections and both attention terms.
    proj = jnp.dot(h_ref[...], wcat_ref[...], preferred_element_type=jnp.float32)
    z_all = proj[:, :hd_total]                                        # [N, H*D]
    sT_all = proj[:, hd_total:hd_total + num_heads].T                 # [H, N] (hoisted)
    d_all = proj[:, hd_total + num_heads:]                            # [N, H]
    bias = bias_ref[...].astype(jnp.float32)                          # [N, N]
    out = _attend_heads(z_all, sT_all, d_all, bias, num_heads, out_dim, mxu_dtype)
    out_ref[...] = out.astype(out_ref.dtype)                          # one lane-dense store


def gat_tiled_kernel(h_src_ref, h_dst_ref, wzs_ref, udstT_ref, bias_ref, out_ref,
                     *, num_heads, out_dim):
    # Tiled path: grid axis 0 = destination-row tiles ("parallel"; tiles are
    # independent since the softmax reduces over the resident source/lane axis).
    # h_src_ref : [N, Fin]      all sources, resident across the grid
    # h_dst_ref : [T, Fin]      destination rows of this tile
    # wzs_ref   : [Fin, H*D+H]  [ W^T | u_src^T ]
    # udstT_ref : [Fin, H]      u_dst^T
    # bias_ref  : [T, N] bf16   additive mask tile (adj^T layout)
    # out_ref   : [T, H*D] f32
    hd_total = num_heads * out_dim
    mxu_dtype = h_src_ref.dtype
    proj = jnp.dot(h_src_ref[...], wzs_ref[...],
                   preferred_element_type=jnp.float32)                # [N, H*D+H]
    z_all = proj[:, :hd_total]                                        # [N, H*D]
    sT_all = proj[:, hd_total:].T                                     # [H, N]
    d_all = jnp.dot(h_dst_ref[...], udstT_ref[...],
                    preferred_element_type=jnp.float32)               # [T, H]
    bias = bias_ref[...].astype(jnp.float32)                          # [T, N]
    out = _attend_heads(z_all, sT_all, d_all, bias, num_heads, out_dim, mxu_dtype)
    out_ref[...] = out.astype(out_ref.dtype)


def _gat_cost(N, Fin, H, D, n_tiles, bytes_accessed):
    HD = H * D
    flops = n_tiles * 2 * N * Fin * (HD + 2 * H)        # projections (redone per dest tile)
    flops += H * 2 * N * N * D                          # alpha^T @ z
    flops += H * 7 * N * N                              # leaky / mask / softmax elementwise
    return pl.CostEstimate(flops=int(flops), transcendentals=int(H * N * N),
                           bytes_accessed=int(bytes_accessed))


def multi_head_gat(h, w, a_src, a_dst, adj, *, dst_tile=None, mxu_dtype=jnp.float32):
    """h:[N,Fin], w:[H,D,Fin], a_src/a_dst:[H,1,D], adj:[N,N] -> [N, H*D] (merge='cat').

    dst_tile=None -> single fused gridless kernel (small graphs, all in VMEM).
    dst_tile=T    -> grid over destination-row tiles of T rows (large graphs); the
                     O(N^2) adjacency bias and the output are the only tiled operands.
    mxu_dtype     -> dtype of MXU operands (jnp.bfloat16 recommended on v6e/v7x for
                     large N); all softmax / VPU / EUP math stays f32.
    """
    N, Fin = h.shape
    H, D, _ = w.shape
    HD = H * D

    # Fold the attention vectors into the fc weights (wrapper side, O(H*D*Fin)):
    #   s_i = z_i . a_src = h_i . (a_src @ W),   d_j = z_j . a_dst = h_j . (a_dst @ W).
    wT = jnp.transpose(w.reshape(HD, Fin))                    # [Fin, H*D]
    u_srcT = jnp.einsum("hd,hdf->fh", a_src[:, 0, :], w)      # [Fin, H]
    u_dstT = jnp.einsum("hd,hdf->fh", a_dst[:, 0, :], w)      # [Fin, H]

    # Additive edge mask in destination-major (adj^T) layout, bf16: halves the only
    # O(N^2) DMA vs f32 and removes the in-kernel compare / bool-mask select.
    bias_t = jnp.where(adj.T > 0, 0.0, NEG_INF).astype(jnp.bfloat16)   # [N, N]

    h_in = h.astype(mxu_dtype)
    vmem = pltpu.MemorySpace.VMEM

    if dst_tile is None or dst_tile >= N:
        # Gridless fused path: one MXU push for all projections, one lane-dense store.
        w_cat = jnp.concatenate([wT, u_srcT, u_dstT], axis=1).astype(mxu_dtype)  # [Fin, HD+2H]
        bytes_acc = (h_in.size * h_in.dtype.itemsize
                     + w_cat.size * w_cat.dtype.itemsize
                     + bias_t.size * bias_t.dtype.itemsize
                     + N * HD * 4)
        return pl.pallas_call(
            functools.partial(gat_fused_kernel, num_heads=H, out_dim=D),
            out_shape=jax.ShapeDtypeStruct((N, HD), jnp.float32),
            in_specs=[pl.BlockSpec(memory_space=vmem)] * 3,
            out_specs=pl.BlockSpec(memory_space=vmem),
            cost_estimate=_gat_cost(N, Fin, H, D, 1, bytes_acc),
        )(h_in, w_cat, bias_t)

    # Tiled path: grid over destination-row tiles.
    assert N % dst_tile == 0 and dst_tile % 8 == 0, (N, dst_tile)
    n_tiles = N // dst_tile
    w_zs = jnp.concatenate([wT, u_srcT], axis=1).astype(mxu_dtype)     # [Fin, HD+H]
    u_dstT = u_dstT.astype(mxu_dtype)                                  # [Fin, H]
    bytes_acc = (h_in.size * h_in.dtype.itemsize * (n_tiles + 1)
                 + w_zs.size * w_zs.dtype.itemsize * n_tiles
                 + u_dstT.size * u_dstT.dtype.itemsize * n_tiles
                 + bias_t.size * bias_t.dtype.itemsize
                 + N * HD * 4)
    return pl.pallas_call(
        functools.partial(gat_tiled_kernel, num_heads=H, out_dim=D),
        out_shape=jax.ShapeDtypeStruct((N, HD), jnp.float32),
        grid=(n_tiles,),
        in_specs=[
            pl.BlockSpec((N, Fin), lambda i: (0, 0), memory_space=vmem),         # sources (resident)
            pl.BlockSpec((dst_tile, Fin), lambda i: (i, 0), memory_space=vmem),  # dest rows
            pl.BlockSpec((Fin, HD + H), lambda i: (0, 0), memory_space=vmem),    # [W^T | u_src^T]
            pl.BlockSpec((Fin, H), lambda i: (0, 0), memory_space=vmem),         # u_dst^T
            pl.BlockSpec((dst_tile, N), lambda i: (i, 0), memory_space=vmem),    # bias tile (O(N^2))
        ],
        out_specs=pl.BlockSpec((dst_tile, HD), lambda i: (i, 0), memory_space=vmem),
        compiler_params=pltpu.CompilerParams(
            dimension_semantics=("parallel",),     # dest tiles independent -> ~2x on v7x megacore
            vmem_limit_bytes=32 * 1024 * 1024,
        ),
        cost_estimate=_gat_cost(N, Fin, H, D, n_tiles, bytes_acc),
    )(h_in, h_in, w_zs, u_dstT, bias_t)


def reference_gat(h, w, a_src, a_dst, adj):
    """Pure-JAX reference of the original per-head forward pass."""
    outs = []
    for hd in range(w.shape[0]):
        z = h @ w[hd].T                                   # [N, D]
        s = z @ a_src[hd, 0]                              # [N]
        d = z @ a_dst[hd, 0]                              # [N]
        e = s[:, None] + d[None, :]
        e = jnp.where(e > 0, e, LEAKY_SLOPE * e)
        e = jnp.where(adj > 0, e, NEG_INF)
        alpha = jax.nn.softmax(e, axis=0)
        outs.append(alpha.T @ z)
    return jnp.concatenate(outs, axis=1)


def build_adjacency(n_nodes):
    """Deterministic small graph, symmetrized like build_graph() (u->v and v->u)."""
    src = np.arange(n_nodes)
    dst = (np.arange(n_nodes) + 1) % n_nodes
    extra_src = np.array([0, 2, 5, 7]) % n_nodes
    extra_dst = np.array([8, 11, 13, 3]) % n_nodes
    u = np.concatenate([src, extra_src, dst, extra_dst])
    v = np.concatenate([dst, extra_dst, src, extra_src])
    adj = np.zeros((n_nodes, n_nodes), dtype=np.float32)
    adj[u, v] = 1.0
    return jnp.asarray(adj)


def init_params(key, in_dim, out_dim, num_heads):
    """Deterministic xavier_normal_(gain=sqrt(2)) init, matching reset_parameters shapes."""
    gain = np.sqrt(2.0)  # calculate_gain('relu')
    k_fc, k_attn = jax.random.split(key)
    std_fc = gain * np.sqrt(2.0 / (in_dim + out_dim))
    w = std_fc * jax.random.normal(k_fc, (num_heads, out_dim, in_dim), jnp.float32)
    std_attn = gain * np.sqrt(2.0 / (2 * out_dim + 1))
    attn_w = std_attn * jax.random.normal(k_attn, (num_heads, 1, 2 * out_dim), jnp.float32)
    a_src = attn_w[:, :, :out_dim]          # [H, 1, D]
    a_dst = attn_w[:, :, out_dim:]          # [H, 1, D]
    return w, a_src, a_dst


if __name__ == "__main__":
    key = jax.random.PRNGKey(0)
    k1h, k1p, k2h, k2p = jax.random.split(key, 4)

    # --- Case 1: tiny graph (module's own scale) -> gridless fused kernel ------
    N1, IN1, OUT1, H1 = 16, 8, 8, 4
    h1 = jax.random.normal(k1h, (N1, IN1), jnp.float32)
    w1, a1s, a1d = init_params(k1p, IN1, OUT1, H1)
    adj1 = build_adjacency(N1)

    out1 = jax.block_until_ready(multi_head_gat(h1, w1, a1s, a1d, adj1))
    ref1 = reference_gat(h1, w1, a1s, a1d, adj1)
    assert out1.shape == (N1, H1 * OUT1), out1.shape
    # approx reciprocal + folded attention weights -> slightly looser than bit-exact.
    np.testing.assert_allclose(np.asarray(out1), np.asarray(ref1), rtol=1e-2, atol=1e-2)

    # --- Case 2: larger graph -> destination-row-tiled grid (grid=(2,), parallel)
    N2, IN2, OUT2, H2 = 256, 32, 16, 4
    h2 = jax.random.normal(k2h, (N2, IN2), jnp.float32)
    w2, a2s, a2d = init_params(k2p, IN2, OUT2, H2)
    adj2 = build_adjacency(N2)

    out2 = jax.block_until_ready(multi_head_gat(h2, w2, a2s, a2d, adj2, dst_tile=128))
    ref2 = reference_gat(h2, w2, a2s, a2d, adj2)
    assert out2.shape == (N2, H2 * OUT2), out2.shape
    np.testing.assert_allclose(np.asarray(out2), np.asarray(ref2), rtol=1e-2, atol=1e-2)

    # --- Case 3: tiled path with bf16 MXU operands (v6e/v7x fast path) ---------
    out3 = jax.block_until_ready(
        multi_head_gat(h2, w2, a2s, a2d, adj2, dst_tile=128, mxu_dtype=jnp.bfloat16))
    assert out3.shape == (N2, H2 * OUT2), out3.shape
    assert bool(jnp.all(jnp.isfinite(out3)))
    rel_err = float(jnp.mean(jnp.abs(out3 - ref2)) / jnp.mean(jnp.abs(ref2)))
    assert rel_err < 0.1, rel_err   # loose sanity bound for bf16 attention logits

    print("KERNEL_OK")
</pallas_src>

<mosaic_0001>
module attributes {stable_mosaic.version = 11 : i64} {
  func.func @gat_fused_kernel(%arg0: memref<16x8xf32, #tpu.memory_space<vmem>>, %arg1: memref<8x40xf32, #tpu.memory_space<vmem>>, %arg2: memref<16x16xbf16, #tpu.memory_space<vmem>>, %arg3: memref<16x32xf32, #tpu.memory_space<vmem>>) attributes {dimension_semantics = [], scalar_prefetch = 0 : i64, scratch_operands = 0 : i64, tpu.core_type = #tpu.core_type<tc>} {
    %c0 = arith.constant 0 : index
    %c0_0 = arith.constant 0 : index
    %0 = vector.load %arg0[%c0, %c0_0] : memref<16x8xf32, #tpu.memory_space<vmem>>, vector<16x8xf32>
    %c0_1 = arith.constant 0 : index
    %c0_2 = arith.constant 0 : index
    %1 = vector.load %arg1[%c0_1, %c0_2] : memref<8x40xf32, #tpu.memory_space<vmem>>, vector<8x40xf32>
    %cst = arith.constant dense<0.000000e+00> : vector<16x40xf32>
    %2 = tpu.matmul %0, %1, %cst {dimension_numbers = #tpu.dot_dimension_numbers<[1], [0], [0], [1], [0, 0, 1, 1], [], []>} : vector<16x8xf32>, vector<8x40xf32>, vector<16x40xf32> -> vector<16x40xf32>
    %3 = vector.extract_strided_slice %2 {offsets = [0, 0], sizes = [16, 32], strides = [1, 1]} : vector<16x40xf32> to vector<16x32xf32>
    %4 = vector.extract_strided_slice %2 {offsets = [0, 32], sizes = [16, 4], strides = [1, 1]} : vector<16x40xf32> to vector<16x4xf32>
    %5 = tpu.transpose %4, [1, 0] : vector<16x4xf32> -> vector<4x16xf32>
    %6 = vector.extract_strided_slice %2 {offsets = [0, 36], sizes = [16, 4], strides = [1, 1]} : vector<16x40xf32> to vector<16x4xf32>
    %c0_3 = arith.constant 0 : index
    %c0_4 = arith.constant 0 : index
    %7 = vector.load %arg2[%c0_3, %c0_4] : memref<16x16xbf16, #tpu.memory_space<vmem>>, vector<16x16xbf16>
    %8 = arith.extf %7 : vector<16x16xbf16> to vector<16x16xf32>
    %9 = vector.extract_strided_slice %6 {offsets = [0, 0], sizes = [16, 1], strides = [1, 1]} : vector<16x4xf32> to vector<16x1xf32>
    %10 = vector.extract_strided_slice %5 {offsets = [0, 0], sizes = [1, 16], strides = [1, 1]} : vector<4x16xf32> to vector<1x16xf32>
    %11 = vector.broadcast %9 : vector<16x1xf32> to vector<16x16xf32>
    %12 = vector.broadcast %10 : vector<1x16xf32> to vector<16x16xf32>
    %13 = arith.addf %11, %12 : vector<16x16xf32>
    %cst_5 = arith.constant 0.00999999977 : f32
    %14 = vector.broadcast %cst_5 : f32 to vector<16x16xf32>
    %15 = arith.mulf %14, %13 : vector<16x16xf32>
    %16 = arith.maximumf %13, %15 : vector<16x16xf32>
    %17 = arith.addf %16, %8 : vector<16x16xf32>
    %cst_6 = arith.constant dense<0xFF800000> : vector<16xf32>
    %18 = vector.multi_reduction <maximumf>, %17, %cst_6 [1] : vector<16x16xf32> to vector<16xf32>
    %19 = vector.shape_cast %18 : vector<16xf32> to vector<16x1xf32>
    %20 = vector.broadcast %19 : vector<16x1xf32> to vector<16x16xf32>
    %21 = arith.subf %17, %20 : vector<16x16xf32>
    %22 = math.exp %21 : vector<16x16xf32>
    %cst_7 = arith.constant dense<0.000000e+00> : vector<16xf32>
    %23 = vector.multi_reduction <add>, %22, %cst_7 [1] : vector<16x16xf32> to vector<16xf32>
    %24 = vector.shape_cast %23 : vector<16xf32> to vector<16x1xf32>
    %25 = tpu.reciprocal %24 {approx = true} : vector<16x1xf32> -> vector<16x1xf32>
    %26 = vector.broadcast %25 : vector<16x1xf32> to vector<16x16xf32>
    %27 = arith.mulf %22, %26 : vector<16x16xf32>
    %28 = vector.extract_strided_slice %3 {offsets = [0, 0], sizes = [16, 8], strides = [1, 1]} : vector<16x32xf32> to vector<16x8xf32>
    %cst_8 = arith.constant dense<0.000000e+00> : vector<16x8xf32>
    %29 = tpu.matmul %27, %28, %cst_8 {dimension_numbers = #tpu.dot_dimension_numbers<[1], [0], [0], [1], [0, 0, 1, 1], [], []>} : vector<16x16xf32>, vector<16x8xf32>, vector<16x8xf32> -> vector<16x8xf32>
    %30 = vector.extract_strided_slice %6 {offsets = [0, 1], sizes = [16, 1], strides = [1, 1]} : vector<16x4xf32> to vector<16x1xf32>
    %31 = vector.extract_strided_slice %5 {offsets = [1, 0], sizes = [1, 16], strides = [1, 1]} : vector<4x16xf32> to vector<1x16xf32>
    %32 = vector.broadcast %30 : vector<16x1xf32> to vector<16x16xf32>
    %33 = vector.broadcast %31 : vector<1x16xf32> to vector<16x16xf32>
    %34 = arith.addf %32, %33 : vector<16x16xf32>
    %cst_9 = arith.constant 0.00999999977 : f32
    %35 = vector.broadcast %cst_9 : f32 to vector<16x16xf32>
    %36 = arith.mulf %35, %34 : vector<16x16xf32>
    %37 = arith.maximumf %34, %36 : vector<16x16xf32>
    %38 = arith.addf %37, %8 : vector<16x16xf32>
    %cst_10 = arith.constant dense<0xFF800000> : vector<16xf32>
    %39 = vector.multi_reduction <maximumf>, %38, %cst_10 [1] : vector<16x16xf32> to vector<16xf32>
    %40 = vector.shape_cast %39 : vector<16xf32> to vector<16x1xf32>
    %41 = vector.broadcast %40 : vector<16x1xf32> to vector<16x16xf32>
    %42 = arith.subf %38, %41 : vector<16x16xf32>
    %43 = math.exp %42 : vector<16x16xf32>
    %cst_11 = arith.constant dense<0.000000e+00> : vector<16xf32>
    %44 = vector.multi_reduction <add>, %43, %cst_11 [1] : vector<16x16xf32> to vector<16xf32>
    %45 = vector.shape_cast %44 : vector<16xf32> to vector<16x1xf32>
    %46 = tpu.reciprocal %45 {approx = true} : vector<16x1xf32> -> vector<16x1xf32>
    %47 = vector.broadcast %46 : vector<16x1xf32> to vector<16x16xf32>
    %48 = arith.mulf %43, %47 : vector<16x16xf32>
    %49 = vector.extract_strided_slice %3 {offsets = [0, 8], sizes = [16, 8], strides = [1, 1]} : vector<16x32xf32> to vector<16x8xf32>
    %cst_12 = arith.constant dense<0.000000e+00> : vector<16x8xf32>
    %50 = tpu.matmul %48, %49, %cst_12 {dimension_numbers = #tpu.dot_dimension_numbers<[1], [0], [0], [1], [0, 0, 1, 1], [], []>} : vector<16x16xf32>, vector<16x8xf32>, vector<16x8xf32> -> vector<16x8xf32>
    %51 = vector.extract_strided_slice %6 {offsets = [0, 2], sizes = [16, 1], strides = [1, 1]} : vector<16x4xf32> to vector<16x1xf32>
    %52 = vector.extract_strided_slice %5 {offsets = [2, 0], sizes = [1, 16], strides = [1, 1]} : vector<4x16xf32> to vector<1x16xf32>
    %53 = vector.broadcast %51 : vector<16x1xf32> to vector<16x16xf32>
    %54 = vector.broadcast %52 : vector<1x16xf32> to vector<16x16xf32>
    %55 = arith.addf %53, %54 : vector<16x16xf32>
    %cst_13 = arith.constant 0.00999999977 : f32
    %56 = vector.broadcast %cst_13 : f32 to vector<16x16xf32>
    %57 = arith.mulf %56, %55 : vector<16x16xf32>
    %58 = arith.maximumf %55, %57 : vector<16x16xf32>
    %59 = arith.addf %58, %8 : vector<16x16xf32>
    %cst_14 = arith.constant dense<0xFF800000> : vector<16xf32>
    %60 = vector.multi_reduction <maximumf>, %59, %cst_14 [1] : vector<16x16xf32> to vector<16xf32>
    %61 = vector.shape_cast %60 : vector<16xf32> to vector<16x1xf32>
    %62 = vector.broadcast %61 : vector<16x1xf32> to vector<16x16xf32>
    %63 = arith.subf %59, %62 : vector<16x16xf32>
    %64 = math.exp %63 : vector<16x16xf32>
    %cst_15 = arith.constant dense<0.000000e+00> : vector<16xf32>
    %65 = vector.multi_reduction <add>, %64, %cst_15 [1] : vector<16x16xf32> to vector<16xf32>
    %66 = vector.shape_cast %65 : vector<16xf32> to vector<16x1xf32>
    %67 = tpu.reciprocal %66 {approx = true} : vector<16x1xf32> -> vector<16x1xf32>
    %68 = vector.broadcast %67 : vector<16x1xf32> to vector<16x16xf32>
    %69 = arith.mulf %64, %68 : vector<16x16xf32>
    %70 = vector.extract_strided_slice %3 {offsets = [0, 16], sizes = [16, 8], strides = [1, 1]} : vector<16x32xf32> to vector<16x8xf32>
    %cst_16 = arith.constant dense<0.000000e+00> : vector<16x8xf32>
    %71 = tpu.matmul %69, %70, %cst_16 {dimension_numbers = #tpu.dot_dimension_numbers<[1], [0], [0], [1], [0, 0, 1, 1], [], []>} : vector<16x16xf32>, vector<16x8xf32>, vector<16x8xf32> -> vector<16x8xf32>
    %72 = vector.extract_strided_slice %6 {offsets = [0, 3], sizes = [16, 1], strides = [1, 1]} : vector<16x4xf32> to vector<16x1xf32>
    %73 = vector.extract_strided_slice %5 {offsets = [3, 0], sizes = [1, 16], strides = [1, 1]} : vector<4x16xf32> to vector<1x16xf32>
    %74 = vector.broadcast %72 : vector<16x1xf32> to vector<16x16xf32>
    %75 = vector.broadcast %73 : vector<1x16xf32> to vector<16x16xf32>
    %76 = arith.addf %74, %75 : vector<16x16xf32>
    %cst_17 = arith.constant 0.00999999977 : f32
    %77 = vector.broadcast %cst_17 : f32 to vector<16x16xf32>
    %78 = arith.mulf %77, %76 : vector<16x16xf32>
    %79 = arith.maximumf %76, %78 : vector<16x16xf32>
    %80 = arith.addf %79, %8 : vector<16x16xf32>
    %cst_18 = arith.constant dense<0xFF800000> : vector<16xf32>
    %81 = vector.multi_reduction <maximumf>, %80, %cst_18 [1] : vector<16x16xf32> to vector<16xf32>
    %82 = vector.shape_cast %81 : vector<16xf32> to vector<16x1xf32>
    %83 = vector.broadcast %82 : vector<16x1xf32> to vector<16x16xf32>
    %84 = arith.subf %80, %83 : vector<16x16xf32>
    %85 = math.exp %84 : vector<16x16xf32>
    %cst_19 = arith.constant dense<0.000000e+00> : vector<16xf32>
    %86 = vector.multi_reduction <add>, %85, %cst_19 [1] : vector<16x16xf32> to vector<16xf32>
    %87 = vector.shape_cast %86 : vector<16xf32> to vector<16x1xf32>
    %88 = tpu.reciprocal %87 {approx = true} : vector<16x1xf32> -> vector<16x1xf32>
    %89 = vector.broadcast %88 : vector<16x1xf32> to vector<16x16xf32>
    %90 = arith.mulf %85, %89 : vector<16x16xf32>
    %91 = vector.extract_strided_slice %3 {offsets = [0, 24], sizes = [16, 8], strides = [1, 1]} : vector<16x32xf32> to vector<16x8xf32>
    %cst_20 = arith.constant dense<0.000000e+00> : vector<16x8xf32>
    %92 = tpu.matmul %90, %91, %cst_20 {dimension_numbers = #tpu.dot_dimension_numbers<[1], [0], [0], [1], [0, 0, 1, 1], [], []>} : vector<16x16xf32>, vector<16x8xf32>, vector<16x8xf32> -> vector<16x8xf32>
    %93 = tpu.concatenate %29, %50, %71, %92 in 1 : vector<16x8xf32>, vector<16x8xf32>, vector<16x8xf32>, vector<16x8xf32> -> vector<16x32xf32>
    %c0_21 = arith.constant 0 : index
    %c0_22 = arith.constant 0 : index
    %94 = vector.load %arg3[%c0_21, %c0_22] : memref<16x32xf32, #tpu.memory_space<vmem>>, vector<16x32xf32>
    tpu.vector_store %arg3[%c0_21, %c0_22], %93 {strides = array<i32>} : memref<16x32xf32, #tpu.memory_space<vmem>>, vector<16x32xf32>,
    return
  }
}

</mosaic_0001>

<bundles_post_ra>
// kernel: tpu_custom_call.1
= control target key start
LH: loop header
LB: loop body
LE: loop exit
PB: predicated region body
PF: predicated region fallthrough
CT: control target
= control target key end

     0   :  { %vm18_vm0 = vcmask 64512   ;;  %s956_s0 = inlined_call_operand.vmem [shape: f32[16,8], index: 0, kind: input, shape index: {}]   ;;  %s957_s1 = inlined_call_operand.vmem [shape: f32[8,40], index: 1, kind: input, shape index: {}]   ;;  %s958_s2 = inlined_call_operand.vmem [shape: bf16[16,16], index: 2, kind: input, shape index: {}]   ;;  %s959_s3 = inlined_call_operand.hbm [shape: f32[16,32], index: 3, kind: output, shape index: {}]  }
   0x1   :  { %v17_v0 = vld [vmem:[%s957_s1] sm:$0xff]  ;;  %v16_v2 = vld [vmem:[%s956_s0 + $0x8] sm:$0xff] }
   0x2   :  { %v15_v1 = vld [vmem:[%s956_s0] sm:$0xff]  ;;  %738 = vmatprep.subr.mxu0 %v17_v0 }
   0x3   :  { %740 = vmatprep.mubr.msk.f32.mxu0 %vm18_vm0, %v15_v1 }
   0x4   :  { %8 = vsyncpa [#allocation3], 0  ;;  %739 = vmatpush3.msra.mxu0 %v17_v0  ;;  %v847_v3 = vmov 36   ;;  %v848_v4 = vmov 38   ;;  %s849_s0 = smov 96   ;;  %v850_v7 = vmov 37   ;;  %v152_v12 = vlaneseq }
   0x5   :  { %785 = vset.pattern.permute.xlu1 %v847_v3  ;;  %741 = vmatmul.mubr.msk.f32.vlgmr.msra.gmra.mxu0 %vm18_vm0, %v16_v2  ;;  %v851_v8 = vmov 39   ;;  %v716_v24 = vld [vmem:[%s958_s2] sm:$0xff]   ;;  %vm164_vm1 = vcmask 130048   ;;  %s852_s2 = smov 120   ;;  %s853_s19 = smov 112   ;;  %vm683_vm2 = vcmask 195584  }
   0x6   :  { %787 = vset.pattern.permute.xlu0 %v848_v4  ;;  %v153_v15 = vshrl.u32 %v152_v12, 7  ;;  %v718_v30 = vunpack.c.h.bf16 %v716_v24  ;;  %v717_v33 = vunpack.c.l.bf16 %v716_v24  ;;  %s854_s20 = smov 104   ;;  %s855_s21 = smov 8   ;;  %vm686_vm3 = vcmask 261120  }
   0x7   :  { %s856_s22 = smov 16   ;;  %s857_s23 = smov 24  }
   0x8   :  { %v154_v17 = vsub.s32 0, %v153_v15  ;;  %v278_v18 = vsub.s32 1, %v153_v15  ;;  %v407_v19 = vsub.s32 2, %v153_v15  ;;  %v536_v36 = vsub.s32 3, %v153_v15  ;;  %s858_s24 = smov [#allocation2]  }
   0x9   :  { %s694_s25 = sshll.u32 %s858_s24, 4  ;;  %s695_s25 = int_to_ptr.vmem [resolvable:$true] %s694_s25 }
   0xa   :  { %s825_s26 = scalar_lea.vmem %s695_s25, 256  ;;  %p830_p1 = scmp.lt.s32.totalorder %s695_s25, %s695_s25 }
   0xb   :  { %p826_p0 = scmp.ne.s32.totalorder %s695_s25, %s825_s26  ;;  %p831_p2 = scmp.lt.s32.totalorder %s825_s26, %s825_s26 }
   0xd   :  { %p832_p3 = por %p831_p2, %p830_p1 }
   0xf   :  { %p833_p4 = pnand %p832_p3, %p826_p0 }
  0xc5   :  { %v891_v5 = vpop.f32.mrf.mxu0 }
  0xc6   :  { %149 = vperm.xlu1 %785, %v891_v5   ;;  %743 = vmatprep.subr.mxu1 %v891_v5 }
  0xc7   :  { %v895_v6 = vpop.f32.mrf.mxu0  ;;  %744 = vmatpush3.msra.mxu1 %v891_v5 }
  0xc8   :  { %102 = vrot.lane.b32.xlu0 %v895_v6, %s849_s0  ;;  %745 = vmatprep.subr.mxu1 %v895_v6 }
  0xc9   :  { %746 = vmatpush3.msra.mxu1 %v895_v6 }
  0xca   :  { %786 = vset.pattern.permute.xlu1 %v850_v7 }
  0xcb   :  { %273 = vperm.xlu1 %786, %v891_v5  }
  0xcc   :  { %104 = vrot.lane.b32.xlu0 %v891_v5, %s849_s0 }
  0xcf   :  { %788 = vset.pattern.permute.xlu1 %v847_v3 }
  0xd0   :  { %145 = vperm.xlu1 %788, %v895_v6   ;;  %402 = vperm.xlu0 %787, %v891_v5  }
  0xd4   :  { %790 = vset.pattern.permute.xlu1 %v848_v4  ;;  %789 = vset.pattern.permute.xlu0 %v850_v7 }
  0xd5   :  { %398 = vperm.xlu1 %790, %v895_v6   ;;  %269 = vperm.xlu0 %789, %v895_v6  }
  0xd9   :  { %791 = vset.pattern.permute.xlu1 %v851_v8 }
  0xda   :  { %527 = vperm.xlu1 %791, %v895_v6  }
  0xde   :  { %531 = vperm.xlu1 %791, %v891_v5  }
 0x13a   :  { %v103_v9 = vpop.permute.xlu0 %102 }
 0x13b   :  { %108 = vxpose.xlu0.b32.start [1/2] (short) (narrow) %v103_v9, 8 }
 0x13e   :  { %v105_v10 = vpop.permute.xlu0 %104 }
 0x13f   :  { %109 = vxpose.xlu0.b32.end [2/2] (short) (narrow) %v105_v10, 8 }
 0x141   :  { %v150_v11 = vpop.permute.xlu1 %149 }
 0x146   :  { %v274_v14 = vpop.permute.xlu1 %273 }
 0x14b   :  { %v403_v13 = vpop.permute.xlu0 %402  ;;  %v146_v20 = vpop.permute.xlu1 %145 }
 0x150   :  { %v270_v16 = vpop.permute.xlu0 %269  ;;  %v399_v31 = vpop.permute.xlu1 %398 }
 0x155   :  { %v528_v47 = vpop.permute.xlu1 %527 }
 0x159   :  { %v532_v57 = vpop.permute.xlu1 %531 }
 0x168   :  { %792 = vset.pattern.permute.xlu0 %v851_v8 }
 0x1b7   :  { %v124_v21 = vpop.trf.xlu0 }
 0x1b8   :  { %v155_v22 = vrot.slane %v124_v21, %v154_v17  ;;  %v279_v23 = vrot.slane %v124_v21, %v278_v18  ;;  %v408_v25 = vrot.slane %v124_v21, %v407_v19  ;;  %v537_v44 = vrot.slane %v124_v21, %v536_v36 }
 0x1ba   :  { %v157_v26 = vadd.f32 %v155_v22, %v150_v11  ;;  %v156_v27 = vadd.f32 %v155_v22, %v146_v20  ;;  %v280_v28 = vadd.f32 %v279_v23, %v270_v16  ;;  %v281_v29 = vadd.f32 %v279_v23, %v274_v14 }
 0x1bb   :  { %v409_v37 = vadd.f32 %v408_v25, %v399_v31  ;;  %v410_v46 = vadd.f32 %v408_v25, %v403_v13  ;;  %v538_v52 = vadd.f32 %v537_v44, %v528_v47  ;;  %v539_v58 = vadd.f32 %v537_v44, %v532_v57 }
 0x1bc   :  { %v159_v32 = vmul.f32 0.01, %v157_v26  ;;  %v158_v34 = vmul.f32 0.01, %v156_v27  ;;  %v282_v35 = vmul.f32 0.01, %v280_v28 }
 0x1bd   :  { %v283_v41 = vmul.f32 0.01, %v281_v29  ;;  %v411_v45 = vmul.f32 0.01, %v409_v37  ;;  %v412_v56 = vmul.f32 0.01, %v410_v46 }
 0x1be   :  { %v161_v38 = vmax.f32 %v157_v26, %v159_v32  ;;  %v160_v39 = vmax.f32 %v156_v27, %v158_v34  ;;  %v284_v40 = vmax.f32 %v280_v28, %v282_v35  ;;  %v540_v62 = vmul.f32 0.01, %v538_v52 }
 0x1bf   :  { %v285_v51 = vmax.f32 %v281_v29, %v283_v41  ;;  %v413_v55 = vmax.f32 %v409_v37, %v411_v45  ;;  %v414_v61 = vmax.f32 %v410_v46, %v412_v56  ;;  %v541_v2 = vmul.f32 0.01, %v539_v58 }
 0x1c0   :  { %v163_v42 = vadd.f32 %v718_v30, %v161_v38  ;;  %v162_v43 = vadd.f32 %v717_v33, %v160_v39  ;;  %v286_v50 = vadd.f32 %v717_v33, %v284_v40  ;;  %v542_v1 = vmax.f32 %v538_v52, %v540_v62 }
 0x1c1   :  { %v287_v54 = vadd.f32 %v718_v30, %v285_v51  ;;  %v415_v60 = vadd.f32 %v717_v33, %v413_v55  ;;  %v416_v0 = vadd.f32 %v718_v30, %v414_v61  ;;  %v543_v7 = vmax.f32 %v539_v58, %v541_v2 }
 0x1c2   :  { %v168_v48 = vsel %vm164_vm1, %v163_v42, -inf  ;;  %v165_v49 = vsel %vm164_vm1, %v162_v43, -inf  ;;  %v288_v53 = vsel %vm164_vm1, %v286_v50, -inf  ;;  %v544_v4 = vadd.f32 %v717_v33, %v542_v1 }
 0x1c3   :  { %169 = vmax.xlane.f32.xlu0 %v168_v48  ;;  %166 = vmax.xlane.f32.xlu1 %v165_v49  ;;  %v291_v59 = vsel %vm164_vm1, %v287_v54, -inf  ;;  %v417_v63 = vsel %vm164_vm1, %v415_v60, -inf  ;;  %v420_v3 = vsel %vm164_vm1, %v416_v0, -inf  ;;  %v545_v9 = vadd.f32 %v718_v30, %v543_v7 }
 0x1c4   :  { %v546_v8 = vsel %vm164_vm1, %v544_v4, -inf }
 0x1c5   :  { %v549_v10 = vsel %vm164_vm1, %v545_v9, -inf }
 0x1c7   :  { %289 = vmax.xlane.f32.xlu1 %v288_v53 }
 0x1cb   :  { %292 = vmax.xlane.f32.xlu1 %v291_v59 }
 0x1cf   :  { %418 = vmax.xlane.f32.xlu1 %v417_v63 }
 0x1d3   :  { %421 = vmax.xlane.f32.xlu1 %v420_v3 }
 0x1d7   :  { %547 = vmax.xlane.f32.xlu1 %v546_v8 }
 0x1d9   :  { %310 = vrot.lane.b32.xlu0 %v895_v6, %s852_s2 }
 0x1db   :  { %550 = vmax.xlane.f32.xlu1 %v549_v10 }
 0x1ec   :  { %312 = vrot.lane.b32.xlu1 %v891_v5, %s852_s2 }
 0x1f0   :  { %441 = vrot.lane.b32.xlu1 %v891_v5, %s853_s19 }
 0x1f4   :  { %570 = vrot.lane.b32.xlu1 %v891_v5, %s854_s20 }
 0x24c   :  { %v170_v11 = vpop.xlane.xlu0 %169  ;;  %v167_v12 = vpop.xlane.xlu1 %166 }
 0x24d   :  { %v172_v13 = vsub.f32 %v163_v42, %v170_v11  ;;  %v171_v14 = vsub.f32 %v162_v43, %v167_v12 }
 0x24f   :  { %v173_v15 = vmul.f32 1.442695, %v171_v14  ;;  %v175_v16 = vmul.f32 1.442695, %v172_v13 }
 0x250   :  { %v290_v17 = vpop.xlane.xlu1 %289  ;;  %v311_v42 = vpop.permute.xlu0 %310 }
 0x251   :  { %v294_v18 = vsub.f32 %v286_v50, %v290_v17  ;;  %793 = vpow2.f32 %v173_v15 }
 0x252   :  { %795 = vpow2.f32 %v175_v16 }
 0x253   :  { %v296_v19 = vmul.f32 1.442695, %v294_v18 }
 0x254   :  { %v293_v20 = vpop.xlane.xlu1 %292 }
 0x255   :  { %v295_v21 = vsub.f32 %v287_v54, %v293_v20  ;;  %797 = vpow2.f32 %v296_v19 }
 0x257   :  { %v298_v22 = vmul.f32 1.442695, %v295_v21 }
 0x258   :  { %v419_v23 = vpop.xlane.xlu1 %418 }
 0x259   :  { %v423_v24 = vsub.f32 %v415_v60, %v419_v23  ;;  %799 = vpow2.f32 %v298_v22 }
 0x25b   :  { %v425_v25 = vmul.f32 1.442695, %v423_v24 }
 0x25c   :  { %v422_v5 = vpop.xlane.xlu1 %421 }
 0x25d   :  { %v424_v26 = vsub.f32 %v416_v0, %v422_v5  ;;  %801 = vpow2.f32 %v425_v25 }
 0x25e   :  { %v794_v27 = vpop.eup %793 }
 0x25f   :  { %v427_v28 = vmul.f32 1.442695, %v424_v26  ;;  %v177_v29 = vsel %vm164_vm1, %v794_v27, 0.0  ;;  %v796_v31 = vpop.eup %795 }
 0x260   :  { %v548_v30 = vpop.xlane.xlu1 %547  ;;  %178 = vadd.xlane.f32.xlu1 %v177_v29  ;;  %v180_v34 = vsel %vm164_vm1, %v796_v31, 0.0 }
 0x261   :  { %803 = vpow2.f32 %v427_v28  ;;  %v552_v32 = vsub.f32 %v544_v4, %v548_v30 }
 0x262   :  { %v798_v36 = vpop.eup %797 }
 0x263   :  { %v554_v33 = vmul.f32 1.442695, %v552_v32  ;;  %v300_v39 = vsel %vm164_vm1, %v798_v36, 0.0 }
 0x264   :  { %v551_v35 = vpop.xlane.xlu1 %550  ;;  %181 = vadd.xlane.f32.xlu1 %v180_v34 }
 0x265   :  { %805 = vpow2.f32 %v554_v33  ;;  %v553_v37 = vsub.f32 %v545_v9, %v551_v35 }
 0x266   :  { %v800_v41 = vpop.eup %799 }
 0x267   :  { %v556_v38 = vmul.f32 1.442695, %v553_v37  ;;  %v303_v43 = vsel %vm164_vm1, %v800_v41, 0.0 }
 0x268   :  { %v313_v40 = vpop.permute.xlu1 %312  ;;  %301 = vadd.xlane.f32.xlu1 %v300_v39 }
 0x269   :  { %807 = vpow2.f32 %v556_v38  ;;  %750 = vmatprep.subr.mxu0 %v313_v40 }
 0x26a   :  { %751 = vmatpush3.msra.mxu0 %v313_v40  ;;  %v802_v45 = vpop.eup %801 }
 0x26b   :  { %752 = vmatprep.subr.mxu0 %v311_v42  ;;  %v429_v48 = vsel %vm164_vm1, %v802_v45, 0.0 }
 0x26c   :  { %753 = vmatpush3.msra.mxu0 %v311_v42  ;;  %v442_v44 = vpop.permute.xlu1 %441  ;;  %304 = vadd.xlane.f32.xlu1 %v303_v43 }
 0x26d   :  { %757 = vmatprep.subr.mxu1 %v442_v44 }
 0x26e   :  { %v804_v46 = vpop.eup %803 }
 0x26f   :  { %v432_v47 = vsel %vm164_vm1, %v804_v46, 0.0 }
 0x270   :  { %433 = vadd.xlane.f32.xlu0 %v432_v47  ;;  %v571_v49 = vpop.permute.xlu1 %570  ;;  %430 = vadd.xlane.f32.xlu1 %v429_v48 }
 0x271   :  { %764 = vmatprep.subr.mxu0 %v571_v49 }
 0x272   :  { %v806_v50 = vpop.eup %805 }
 0x273   :  { %v558_v51 = vsel %vm164_vm1, %v806_v50, 0.0 }
 0x274   :  { %559 = vadd.xlane.f32.xlu1 %v558_v51 }
 0x276   :  { %v808_v52 = vpop.eup %807 }
 0x277   :  { %v561_v53 = vsel %vm164_vm1, %v808_v52, 0.0 }
 0x278   :  { %562 = vadd.xlane.f32.xlu0 %v561_v53 }
 0x285   :  { %568 = vrot.lane.b32.xlu1 %v895_v6, %s854_s20 }
 0x28e   :  { %439 = vrot.lane.b32.xlu0 %v895_v6, %s853_s19 }
 0x2e9   :  { %v179_v54 = vpop.xlane.xlu1 %178 }
 0x2ea   :  { %809 = vrcp.f32 %v179_v54 }
 0x2ed   :  { %v182_v55 = vpop.xlane.xlu1 %181 }
 0x2ee   :  { %811 = vrcp.f32 %v182_v55 }
 0x2f1   :  { %v302_v56 = vpop.xlane.xlu1 %301 }
 0x2f2   :  { %813 = vrcp.f32 %v302_v56 }
 0x2f5   :  { %v305_v57 = vpop.xlane.xlu1 %304 }
 0x2f6   :  { %815 = vrcp.f32 %v305_v57 }
 0x2f7   :  { %v810_v58 = vpop.eup %809 }
 0x2f8   :  { %v185_v60 = vmul.f32 %v810_v58, %v794_v27 }
 0x2f9   :  { %v434_v59 = vpop.xlane.xlu0 %433  ;;  %v431_v61 = vpop.xlane.xlu1 %430 }
 0x2fa   :  { %817 = vrcp.f32 %v434_v59  ;;  %747 = vmatprep.mubr.msk.f32.mxu1 %vm164_vm1, %v185_v60 }
 0x2fb   :  { %819 = vrcp.f32 %v431_v61  ;;  %v812_v62 = vpop.eup %811 }
 0x2fc   :  { %v186_v63 = vmul.f32 %v812_v62, %v796_v31 }
 0x2fd   :  { %v560_v0 = vpop.xlane.xlu1 %559 }
 0x2fe   :  { %821 = vrcp.f32 %v560_v0  ;;  %748 = vmatmul.mubr.msk.f32.vlgmr.msra.gmra.mxu1 %vm164_vm1, %v186_v63 }
 0x2ff   :  { %v814_v6 = vpop.eup %813  ;;  %758 = vmatpush3.msra.mxu1 %v442_v44 }
 0x300   :  { %v308_v2 = vmul.f32 %v814_v6, %v798_v36 }
 0x301   :  { %v563_v1 = vpop.xlane.xlu0 %562  ;;  %v569_v10 = vpop.permute.xlu1 %568 }
 0x302   :  { %823 = vrcp.f32 %v563_v1  ;;  %754 = vmatprep.mubr.msk.f32.mxu0 %vm164_vm1, %v308_v2 }
 0x303   :  { %v816_v3 = vpop.eup %815 }
 0x304   :  { %v309_v7 = vmul.f32 %v816_v3, %v800_v41 }
 0x305   :  { %v440_v4 = vpop.permute.xlu0 %439 }
 0x306   :  { %759 = vmatprep.subr.mxu1 %v440_v4  ;;  %755 = vmatmul.mubr.msk.f32.vlgmr.msra.gmra.mxu0 %vm164_vm1, %v309_v7 }
 0x307   :  { %v818_v8 = vpop.eup %817  ;;  %760 = vmatpush3.msra.mxu1 %v440_v4  ;;  %765 = vmatpush3.msra.mxu0 %v571_v49 }
 0x308   :  { %v820_v9 = vpop.eup %819  ;;  %v438_v11 = vmul.f32 %v818_v8, %v804_v46  ;;  %766 = vmatprep.subr.mxu0 %v569_v10 }
 0x309   :  { %v437_v12 = vmul.f32 %v820_v9, %v802_v45  ;;  %767 = vmatpush3.msra.mxu0 %v569_v10 }
 0x30b   :  { %761 = vmatprep.mubr.msk.f32.mxu1 %vm164_vm1, %v437_v12  ;;  %v822_v13 = vpop.eup %821 }
 0x30c   :  { %762 = vmatmul.mubr.msk.f32.vlgmr.msra.gmra.mxu1 %vm164_vm1, %v438_v11  ;;  %v566_v14 = vmul.f32 %v822_v13, %v806_v50 }
 0x30e   :  { %768 = vmatprep.mubr.msk.f32.mxu0 %vm164_vm1, %v566_v14 }
 0x30f   :  { %v824_v15 = vpop.eup %823 }
 0x310   :  { %v567_v16 = vmul.f32 %v824_v15, %v808_v52 }
 0x312   :  { %769 = vmatmul.mubr.msk.f32.vlgmr.msra.gmra.mxu0 %vm164_vm1, %v567_v16 }
 0x3be   :  { %v749_v17 = vpop.f32.mrf.mxu1 }
 0x3c0   :  { %v259_v20 = vpop.f32.mrf.mxu1 }
 0x3c6   :  { %v756_v18 = vpop.f32.mrf.mxu0 }
 0x3c7   :  { %659 = vrot.lane.b32.xlu1 %v756_v18, %s855_s21 }
 0x3c8   :  { %v388_v19 = vpop.f32.mrf.mxu0 }
 0x3c9   :  { %657 = vrot.lane.b32.xlu0 %v388_v19, %s855_s21 }
 0x3cc   :  { %v763_v21 = vpop.f32.mrf.mxu1 }
 0x3cd   :  { %667 = vrot.lane.b32.xlu1 %v763_v21, %s856_s22 }
 0x3ce   :  { %v517_v22 = vpop.f32.mrf.mxu1 }
 0x3cf   :  { %665 = vrot.lane.b32.xlu0 %v517_v22, %s856_s22 }
 0x3d2   :  { %v770_v23 = vpop.f32.mrf.mxu0 }
 0x3d3   :  { %675 = vrot.lane.b32.xlu1 %v770_v23, %s857_s23 }
 0x3d4   :  { %v646_v24 = vpop.f32.mrf.mxu0 }
 0x3d5   :  { %673 = vrot.lane.b32.xlu0 %v646_v24, %s857_s23 }
 0x439   :  { %v660_v25 = vpop.permute.xlu1 %659 }
 0x43a   :  { %v680_v28 = vsel %vm18_vm0, %v749_v17, %v660_v25 }
 0x43b   :  { %v658_v5 = vpop.permute.xlu0 %657 }
 0x43c   :  { %v679_v31 = vsel %vm18_vm0, %v259_v20, %v658_v5 }
 0x43f   :  { %v668_v26 = vpop.permute.xlu1 %667 }
 0x440   :  { %v682_v29 = vsel %vm164_vm1, %v680_v28, %v668_v26 }
 0x441   :  { %v666_v27 = vpop.permute.xlu0 %665 }
 0x442   :  { %v681_v33 = vsel %vm164_vm1, %v679_v31, %v666_v27 }
 0x445   :  { %v676_v30 = vpop.permute.xlu1 %675 }
 0x446   :  { %v685_v32 = vsel %vm683_vm2, %v682_v29, %v676_v30 }
 0x447   :  { %688 = vst.msk [vmem:[#allocation2 + $0x8] sm:$0xff] %vm686_vm3, %v685_v32  ;;  %v674_v34 = vpop.permute.xlu0 %673 }
 0x448   :  { %v684_v35 = vsel %vm683_vm2, %v681_v33, %v674_v34 }
 0x449   :  { %687 = vst.msk [vmem:[#allocation2] sm:$0xff] %vm686_vm3, %v684_v35 }
 0x44a   :  { %836 = shalt.err (!%p833_p4)
}
 0x44b   :  { %s859_s27 = smov 128  }
 0x44c   :  { %700 = dma.vmem_to_hbm [thread:$0]  %s695_s25, 256, %s959_s3, [#allocation3], %s859_s27, %s859_s27, %s855_s21  }
 0x44d   :  { %845 = dma.done.wait [#allocation3], 256  }
 0x44e   :  { %846 = vsyncadd [#allocation3], 4294967040 }
 0x44f   :  { %704 = vsyncpa [#allocation3], 1 }

</bundles_post_ra>
